<compile_context>
chip_gen: v5e
topology: v5e:2x2
jax: 0.10.0
libtpu: 0.0.40
codegen_flags: <defaults>
</compile_context>

<pallas_src>
import functools

import jax
import jax.numpy as jnp
from jax import lax
from jax.experimental import pallas as pl
from jax.experimental.pallas import tpu as pltpu


# --------------------------------------------------------------------------
# kernels
# --------------------------------------------------------------------------
def _mean_kernel(x_ref, w_ref, b_ref, o_ref):
    # x_ref: (Bb, Cin, TP)  w_ref: (Cout, Cin)  b_ref: (Cout, 1)
    # o_ref: (Bb, Cout, TP)
    bb = x_ref.shape[0]
    for bi in range(bb):  # small, static
        y = jnp.dot(w_ref[...], x_ref[bi], preferred_element_type=jnp.float32)
        o_ref[bi] = (y + b_ref[...]).astype(o_ref.dtype)


def _variance_kernel(x_ref, w_all_ref, b_all_ref, w_sum_ref, b_sum_ref, g_ref,
                     mean_ref, varp_ref, sum_acc, sq_acc,
                     *, n_models, n_batch, tsub):
    # grid = (P_tiles, B); batch (the reduction axis) is innermost.
    b = pl.program_id(1)
    tp = sq_acc.shape[-1]

    @pl.when(b == 0)
    def _():
        sum_acc[...] = jnp.zeros_like(sum_acc)   # resident across the B axis
        sq_acc[...] = jnp.zeros_like(sq_acc)

    def compute_chunk(off, span):
        xs = x_ref[0, :, pl.ds(off, span)]                       # (Cin, span)
        # sum over models, pre-folded: W_sum @ x + b_sum  (one small matmul)
        s = jnp.dot(w_sum_ref[...], xs,
                    preferred_element_type=jnp.float32) + b_sum_ref[...]
        sum_acc[:, pl.ds(off, span)] += s
        # all N members in one matmul: (N*Cout, Cin) @ (Cin, span)
        y = jnp.dot(w_all_ref[...], xs,
                    preferred_element_type=jnp.float32) + b_all_ref[...]
        # per-channel sum of squares over the model axis via a tiny grouping
        # matmul (G[c, m*Cout+c'] = (c == c')) -- avoids sublane reshapes.
        sq_acc[:, pl.ds(off, span)] += jnp.dot(
            g_ref[...], y * y, preferred_element_type=jnp.float32)

    n_sub = tp // tsub
    if n_sub == 1:
        compute_chunk(0, tp)
    else:
        def body(i, carry):
            compute_chunk(pl.multiple_of(i * tsub, 128), tsub)
            return carry
        lax.fori_loop(0, n_sub, body, None, unroll=n_sub <= 8)

    @pl.when(b == n_batch - 1)
    def _():
        count = float(n_models * n_batch)
        mean = sum_acc[...] * (1.0 / count)
        # TODO(synk): computational-formula variance can cancel when
        # |mean| >> std (worse in low precision); a centered/Welford finalize
        # needs a second pass over the batch.  Also matches torch ddof=1:
        # count == 1 yields NaN.
        var = (sq_acc[...] - count * mean * mean) * (1.0 / (count - 1.0))
        mean_ref[...] = mean.astype(mean_ref.dtype)
        varp_ref[0] = jnp.sum(var, axis=1, keepdims=True)  # (Cout, 1) partial


# --------------------------------------------------------------------------
# tiling helpers
# --------------------------------------------------------------------------
def _vmem_limit_bytes():
    cap = 64 * 1024 * 1024
    try:
        info = pltpu.get_tpu_info()
        cap = int(getattr(info, "vmem_capacity_bytes", cap))
    except Exception:
        pass
    return int(min(cap * 3 // 4, 112 * 1024 * 1024))


def _pick_tp(p, per_lane_bytes, budget_bytes, cap=32768):
    """Largest multiple-of-128 divisor of p (<= cap) whose per-step bytes fit."""
    if p % 128 != 0:
        return p                      # full-extent block (small / odd spatial)
    best = 128
    tp = 128
    hi = min(p, cap)
    while tp <= hi:
        if p % tp == 0 and per_lane_bytes * tp <= budget_bytes:
            best = tp
        tp += 128
    return best


def _pick_tsub(tp, n_rows, cap=1024):
    """Sub-chunk of the spatial tile bounding live Y/Y^2 vreg pressure."""
    if tp % 128 != 0:
        return tp
    rows8 = -(-n_rows // 8)
    t = max(128, min(cap, tp, (3072 // max(rows8, 1)) // 128 * 128))
    while t > 128 and tp % t != 0:
        t -= 128
    return max(t, 128)


def _largest_divisor_at_most(n, cap):
    cap = max(1, min(n, cap))
    for d in range(cap, 0, -1):
        if n % d == 0:
            return d
    return 1


# --------------------------------------------------------------------------
# wrapper
# --------------------------------------------------------------------------
def averaging_model_forward(x_nchw, weights, biases,
                            return_summed_variance=False, compute_dtype=None):
    """weights: (N, Cout, Cin) squeezed 1x1-conv weights, biases: (N, Cout)."""
    if compute_dtype is not None and x_nchw.dtype != compute_dtype:
        x_nchw = x_nchw.astype(compute_dtype)      # bf16 HBM I/O recommended

    B, Cin, H, W = x_nchw.shape
    N, Cout, _ = weights.shape
    P = H * W
    x = x_nchw.reshape(B, Cin, P)                  # (B, Cin, P) -- no transpose
    isz = x.dtype.itemsize
    vmem_limit = _vmem_limit_bytes()
    w_cast = weights.astype(x.dtype)               # bf16 MXU feed, f32 accumulate

    if not return_summed_variance:
        # mean_m(W_m x + b_m) == W_mean x + b_mean : one matmul per tile.
        w_mean = w_cast.astype(jnp.float32).mean(0).astype(x.dtype)     # (Cout, Cin)
        b_mean = biases.astype(jnp.float32).mean(0).reshape(Cout, 1)    # (Cout, 1)

        per_lane = 2 * Cin * isz + 2 * Cout * isz + Cout * 4            # x, out, y
        budget = max(vmem_limit - (Cout * Cin * isz + Cout * 4) - (2 << 20),
                     per_lane * 128)
        TP = _pick_tp(P, per_lane, budget)
        Bb = _largest_divisor_at_most(
            B, min(8, max(1, budget // max(per_lane * TP, 1))))
        # keep >= 2 grid steps so both v7x TensorCores have work
        while (B // Bb) * (P // TP) < 2 and Bb > 1:
            Bb = _largest_divisor_at_most(B, Bb - 1)
        if (B // Bb) * (P // TP) < 2 and TP % 256 == 0:
            TP //= 2

        out = pl.pallas_call(
            _mean_kernel,
            out_shape=jax.ShapeDtypeStruct((B, Cout, P), x.dtype),
            grid_spec=pltpu.PrefetchScalarGridSpec(
                num_scalar_prefetch=0,
                grid=(B // Bb, P // TP),
                in_specs=[
                    pl.BlockSpec((Bb, Cin, TP), lambda bi, p: (bi, 0, p)),
                    pl.BlockSpec((Cout, Cin), lambda bi, p: (0, 0)),
                    pl.BlockSpec((Cout, 1), lambda bi, p: (0, 0)),
                ],
                out_specs=pl.BlockSpec((Bb, Cout, TP), lambda bi, p: (bi, 0, p)),
            ),
            compiler_params=pltpu.CompilerParams(
                dimension_semantics=("parallel", "parallel"),
                vmem_limit_bytes=vmem_limit),
        )(x, w_mean, b_mean)
        return out.reshape(B, Cout, H, W)

    # ---- variance branch ----
    NC = N * Cout
    w_all = w_cast.reshape(NC, Cin)                                     # (N*Cout, Cin)
    b_all = biases.reshape(NC, 1).astype(jnp.float32)                   # (N*Cout, 1)
    w_sum = w_cast.astype(jnp.float32).sum(0).astype(x.dtype)           # (Cout, Cin)
    b_sum = biases.astype(jnp.float32).sum(0).reshape(Cout, 1)          # (Cout, 1)
    g = jnp.tile(jnp.eye(Cout, dtype=jnp.float32), (1, N))              # (Cout, N*Cout)

    tsub_cap = 1024
    per_lane = 2 * Cin * isz + 2 * Cout * isz + 2 * Cout * 4            # x, mean, acc
    fixed = ((NC + Cout) * Cin * isz + (NC + Cout) * 4 + Cout * NC * 4
             + 2 * NC * tsub_cap * 4 + (2 << 20))                       # weights, G, Y/Y^2
    TP = _pick_tp(P, per_lane, max(vmem_limit - fixed, per_lane * 128))
    TSUB = _pick_tsub(TP, NC, cap=tsub_cap)
    P_TILES = P // TP

    mean_f, var_part = pl.pallas_call(
        functools.partial(_variance_kernel, n_models=N, n_batch=B, tsub=TSUB),
        out_shape=(jax.ShapeDtypeStruct((Cout, P), x.dtype),
                   jax.ShapeDtypeStruct((P_TILES, Cout, 1), jnp.float32)),
        grid_spec=pltpu.PrefetchScalarGridSpec(
            num_scalar_prefetch=0,
            grid=(P_TILES, B),                      # batch (reduction) innermost
            in_specs=[
                pl.BlockSpec((1, Cin, TP), lambda p, b: (b, 0, p)),
                pl.BlockSpec((NC, Cin), lambda p, b: (0, 0)),
                pl.BlockSpec((NC, 1), lambda p, b: (0, 0)),
                pl.BlockSpec((Cout, Cin), lambda p, b: (0, 0)),
                pl.BlockSpec((Cout, 1), lambda p, b: (0, 0)),
                pl.BlockSpec((Cout, NC), lambda p, b: (0, 0)),
            ],
            out_specs=[pl.BlockSpec((Cout, TP), lambda p, b: (0, p)),
                       pl.BlockSpec((1, Cout, 1), lambda p, b: (p, 0, 0))],
            scratch_shapes=[pltpu.VMEM((Cout, TP), jnp.float32),
                            pltpu.VMEM((Cout, TP), jnp.float32)],
        ),
        compiler_params=pltpu.CompilerParams(
            dimension_semantics=("parallel", "arbitrary"),   # megacore over tiles
            vmem_limit_bytes=vmem_limit),
    )(x, w_all, b_all, w_sum, b_sum, g)

    mean_nchw = mean_f.reshape(1, Cout, H, W)       # keepdim mean over concat dim 0
    variances = var_part.sum(axis=0).reshape(Cout)  # reduce per-tile partial sums
    return mean_nchw, variances


# --------------------------------------------------------------------------
# test
# --------------------------------------------------------------------------
if __name__ == "__main__":
    # TODO(synk): the original module accepts arbitrary nn.Modules as ensemble
    # members; only pointwise-conv (1x1) members are representable here.
    key = jax.random.PRNGKey(0)
    B, Cin, Cout, H, W, N_MODELS = 2, 4, 4, 16, 16, 3
    kx, kw, kb = jax.random.split(key, 3)

    x_f32 = jax.random.normal(kx, (B, Cin, H, W), jnp.float32)
    weights = 0.1 * jax.random.normal(kw, (N_MODELS, Cout, Cin), jnp.float32)
    biases = 0.1 * jax.random.normal(kb, (N_MODELS, Cout), jnp.float32)

    def reference(xf, wf, bf):
        preds = jnp.stack([jnp.einsum("oc,bchw->bohw", wf[m], xf)
                           + bf[m][None, :, None, None]
                           for m in range(wf.shape[0])])                # (N,B,Co,H,W)
        y = jnp.mean(preds, axis=0)
        cat = preds.reshape(-1, *preds.shape[2:])                       # concat dim 0
        mean = jnp.mean(cat, axis=0, keepdims=True)
        var = jnp.sum(jnp.var(cat, axis=0, ddof=1), axis=(1, 2))
        return y, mean, var

    # --- primary path: bf16 HBM I/O, f32 accumulation ---
    x_bf16 = x_f32.astype(jnp.bfloat16)
    y_bf = averaging_model_forward(x_bf16, weights, biases, False)
    mean_bf, var_bf = averaging_model_forward(x_bf16, weights, biases, True)
    jax.block_until_ready((y_bf, mean_bf, var_bf))

    y_ref_bf, mean_ref_bf, var_ref_bf = reference(
        x_bf16.astype(jnp.float32),
        weights.astype(jnp.bfloat16).astype(jnp.float32), biases)
    assert y_bf.shape == (B, Cout, H, W) and y_bf.dtype == jnp.bfloat16
    assert mean_bf.shape == (1, Cout, H, W)
    assert var_bf.shape == (Cout,)
    assert jnp.allclose(y_bf.astype(jnp.float32), y_ref_bf, atol=3e-2, rtol=3e-2)
    assert jnp.allclose(mean_bf.astype(jnp.float32), mean_ref_bf, atol=3e-2, rtol=3e-2)
    assert jnp.allclose(var_bf, var_ref_bf, atol=5e-2, rtol=8e-2)

    # --- f32 path: validates the exact fold semantics tightly ---
    y32 = averaging_model_forward(x_f32, weights, biases, False)
    mean32, var32 = averaging_model_forward(x_f32, weights, biases, True)
    jax.block_until_ready((y32, mean32, var32))
    y_ref, mean_ref, var_ref = reference(x_f32, weights, biases)
    assert jnp.allclose(y32, y_ref, atol=1e-4, rtol=1e-4)
    assert jnp.allclose(mean32, mean_ref, atol=1e-4, rtol=1e-4)
    assert jnp.allclose(var32, var_ref, atol=1e-3, rtol=1e-3)

    print("KERNEL_OK")
</pallas_src>

<mosaic_0001>
module attributes {stable_mosaic.version = 11 : i64} {
  func.func @_mean_kernel(%arg0: i32, %arg1: i32, %arg2: memref<1x4x256xbf16, #tpu.memory_space<vmem>>, %arg3: memref<4x4xbf16, #tpu.memory_space<vmem>>, %arg4: memref<4x1xf32, #tpu.memory_space<vmem>>, %arg5: memref<1x4x256xbf16, #tpu.memory_space<vmem>>) attributes {dimension_semantics = [#tpu.dimension_semantics<parallel>, #tpu.dimension_semantics<parallel>], iteration_bounds = array<i64: 2, 1>, scalar_prefetch = 0 : i64, scratch_operands = 0 : i64, tpu.core_type = #tpu.core_type<tc>, window_params = [{transform_indices = @transform_0, window_bounds = array<i64: 1, 4, 256>}, {pipeline_mode = #tpu.pipeline_mode<synchronous>, transform_indices = @transform_1, window_bounds = array<i64: 4, 4>}, {pipeline_mode = #tpu.pipeline_mode<synchronous>, transform_indices = @transform_2, window_bounds = array<i64: 4, 1>}, {transform_indices = @transform_3, window_bounds = array<i64: 1, 4, 256>}]} {
    %c0 = arith.constant 0 : index
    %c0_0 = arith.constant 0 : index
    %0 = vector.load %arg3[%c0, %c0_0] : memref<4x4xbf16, #tpu.memory_space<vmem>>, vector<4x4xbf16>
    %c0_1 = arith.constant 0 : index
    %c0_2 = arith.constant 0 : index
    %c0_3 = arith.constant 0 : index
    %1 = vector.load %arg2[%c0_1, %c0_2, %c0_3] : memref<1x4x256xbf16, #tpu.memory_space<vmem>>, vector<1x4x256xbf16>
    %2 = vector.shape_cast %1 : vector<1x4x256xbf16> to vector<4x256xbf16>
    %cst = arith.constant dense<0.000000e+00> : vector<4x256xf32>
    %3 = tpu.matmul %0, %2, %cst {dimension_numbers = #tpu.dot_dimension_numbers<[1], [0], [0], [1], [0, 0, 1, 1], [], []>} : vector<4x4xbf16>, vector<4x256xbf16>, vector<4x256xf32> -> vector<4x256xf32>
    %c0_4 = arith.constant 0 : index
    %c0_5 = arith.constant 0 : index
    %4 = vector.load %arg4[%c0_4, %c0_5] : memref<4x1xf32, #tpu.memory_space<vmem>>, vector<4x1xf32>
    %5 = vector.broadcast %4 : vector<4x1xf32> to vector<4x256xf32>
    %6 = arith.addf %3, %5 : vector<4x256xf32>
    %7 = arith.truncf %6 : vector<4x256xf32> to vector<4x256xbf16>
    %c0_6 = arith.constant 0 : index
    %c0_7 = arith.constant 0 : index
    %c0_8 = arith.constant 0 : index
    %8 = vector.load %arg5[%c0_6, %c0_7, %c0_8] : memref<1x4x256xbf16, #tpu.memory_space<vmem>>, vector<1x4x256xbf16>
    %9 = vector.shape_cast %8 : vector<1x4x256xbf16> to vector<4x256xbf16>
    %10 = vector.shape_cast %7 : vector<4x256xbf16> to vector<1x4x256xbf16>
    tpu.vector_store %arg5[%c0_6, %c0_7, %c0_8], %10 {strides = array<i32>} : memref<1x4x256xbf16, #tpu.memory_space<vmem>>, vector<1x4x256xbf16>,
    return
  }
  func.func @transform_0(%arg0: i32, %arg1: i32) -> (i32, i32, i32) {
    %c0_i32 = arith.constant 0 : i32
    %c0_i32_0 = arith.constant 0 : i32
    return %arg0, %c0_i32, %arg1 : i32, i32, i32
  }
  func.func @transform_1(%arg0: i32, %arg1: i32) -> (i32, i32) {
    %c0_i32 = arith.constant 0 : i32
    %c0_i32_0 = arith.constant 0 : i32
    %c0_i32_1 = arith.constant 0 : i32
    return %c0_i32, %c0_i32_0 : i32, i32
  }
  func.func @transform_2(%arg0: i32, %arg1: i32) -> (i32, i32) {
    %c0_i32 = arith.constant 0 : i32
    %c0_i32_0 = arith.constant 0 : i32
    %c0_i32_1 = arith.constant 0 : i32
    return %c0_i32, %c0_i32_0 : i32, i32
  }
  func.func @transform_3(%arg0: i32, %arg1: i32) -> (i32, i32, i32) {
    %c0_i32 = arith.constant 0 : i32
    %c0_i32_0 = arith.constant 0 : i32
    return %arg0, %c0_i32, %arg1 : i32, i32, i32
  }
}

</mosaic_0001>

<bundles_post_ra>
// kernel: tpu_custom_call.1
= control target key start
LH: loop header
LB: loop body
LE: loop exit
PB: predicated region body
PF: predicated region fallthrough
CT: control target
= control target key end

     0   :  { %8 = vsyncpa [#allocation3], 0  ;;  %s715_s0 = inlined_call_operand.hbm [shape: bf16[2,4,256], index: 0, kind: input, shape index: {}]   ;;  %s716_s1 = inlined_call_operand.vmem [shape: bf16[4,4], index: 1, kind: input, shape index: {}]   ;;  %s717_s2 = inlined_call_operand.vmem [shape: f32[4,1], index: 2, kind: input, shape index: {}]   ;;  %s718_s3 = inlined_call_operand.hbm [shape: bf16[2,4,256], index: 3, kind: output, shape index: {}]  }
   0x1   :  { %10 = vsyncpa [#allocation3 + $0x1], 0 }
   0x2   :  { %11 = vsyncpa [#allocation4], 0 }
   0x3   :  { %13 = vsyncpa [#allocation4 + $0x1], 0  ;;  %s586_s12 = smov 0   ;;  %s588_s13 = smov 0  }
   0x4   :  { %s590_s14 = smov 0   ;;  %s592_s15 = smov 0  }
   0x5   :  { %s594_s16 = smov 0   ;;  %s596_s17 = smov 0  }
   0x6 LB: > { %s368_s18 = sadd.s32 4294967295, %s563_s17   ;;  %s369_s19 = sadd.s32 4294967294, %s563_s17   ;;  %s563_s17 = sphi %s596_s17, %s19_s17   ;;  %s559_s16 = sphi %s594_s16, %s727_s16   ;;  %s555_s15 = sphi %s592_s15, %s726_s15   ;;  %s551_s14 = sphi %s590_s14, %s725_s14   ;;  %s547_s13 = sphi %s588_s13, %s724_s13   ;;  %s543_s12 = sphi %s586_s12, %s723_s12  }
   0x7   : > { %s31_s20 = sadd.s32 1, %s559_s16  ;;  %s40_s21 = sadd.s32 1, %s551_s14 }
   0x8   : > { %p33_p0 = scmp.ge.s32.totalorder %s31_s20, 2  ;;  %p47_p1 = scmp.ne.s32.totalorder %s551_s14, %s547_s13 }
   0x9   : > { %p48_p2 = scmp.eq.s32.totalorder %s563_s17, 0  ;;  %p53_p3 = scmp.ne.s32.totalorder %s547_s13, %s543_s12 }
   0xa   : > { %s729_s20 = smov (%p33_p0, %s31_s20), 0  ;;  %p54_p5 = scmp.eq.s32.totalorder %s368_s18, 0 }
   0xb   : > { %p627_p4 = por %p48_p2, %p47_p1  ;;  %s35_s23 = ssub.s32 %s559_s16, %s729_s20 }
   0xc   : > { %p121_p6 = scmp.eq.s32.totalorder %s368_s18, 1  ;;  %p38_p7 = scmp.eq.s32.totalorder %s35_s23, 0 }
   0xd   : > { %p633_p8 = por %p54_p5, %p53_p3  ;;  %p127_p10 = scmp.eq.s32.totalorder %s369_s19, 1 }
   0xe   : > { %p637_p9 = por %p121_p6, %p47_p1  ;;  %p371_p12 = scmp.ge.s32.totalorder %s563_s17, 2 }
   0xf   : > { %s642_s26 = scalar_select %p38_p7, %s551_s14, %s40_s21  }
  0x10   : > { %p644_p11 = por %p127_p10, %p53_p3  ;;  %p399_p13 = scmp.lt.s32.totalorder %s563_s17, 2 }
  0x11   : > { %s153_s28 = sand.u32 1, %s551_s14   ;;  %s385_s30 = sshll.u32 %s559_s16, 2 }
  0x12   : > { %s372_s29 = sshll.u32 %s153_s28, 2  ;;  %s164_s6 = scalar_lea.hbm %s715_s0, %s385_s30 }
  0x13   : > { %s157_s7 = scalar_lea.vmem [#allocation2], %s372_s29  ;;  %s166_s9 = sshll.u32 %s164_s6, 4  ;;  %s167_s9 = int_to_ptr.hbm [resolvable:$true] %s166_s9 }
  0x14   : > { %s168_s8 = sshll.u32 %s157_s7, 4  ;;  %p392_p0 = pnand %p399_p13, %p627_p4  ;;  %s169_s8 = int_to_ptr.vmem [resolvable:$true] %s168_s8 }
  0x15   : > { %p375_p1 = scmp.ge.s32.totalorder %s563_s17, 1  ;;  %p173_p2 = scmp.lt.s32.totalorder %s563_s17, 3 }
  0x16   : > { %s154_s10 = scalar_lea.sflag [#allocation3], %s153_s28 }
  0x17   : > { %394 = dma.hbm_to_vmem [thread:$0]  (!%p392_p0), %s167_s9, 64, %s169_s8, %s154_s10  }
  0x18   : > { %p174_p3 = pnand %p375_p1, %p173_p2 }
  0x19   : > { %s660_s11 = sand.u32 (!%p174_p3), 1, %s547_s13  }
  0x1a   : > { %177 = sbr.rel (%p174_p3) target bundleno = 181 (0xb5), region = 32  ;;  %s376_s18 = sshll.u32 (!%p174_p3), %s660_s11, 2 }
  0x1b   : > { %s180_s19 = scalar_lea.sflag (!%p174_p3), [#allocation3], %s660_s11  ;;  %s183_s21 = scalar_lea.vmem (!%p174_p3), [#allocation2], %s376_s18 }
  0x1f   : > { %534 = dma.done.wait (%p633_p8), %s180_s19, 64  }
  0x20   : > { %536 = vsyncadd (%p633_p8), %s180_s19, 4294967232  ;;  %v565_v0 = vmov 0   ;;  %v211_v1 = vld [vmem:[%s183_s21] sm:$0xf]  ;;  %v212_v2 = vld [vmem:[%s717_s2] sm:$0xf] }
  0x21   : > { %450 = vset.pattern.permute.xlu0 %v565_v0  ;;  %219 = vst [vmem:[#allocation1] ss:$4 sm:$0xff] %v211_v1  ;;  %vm226_vm0 = vcmask 1041408   ;;  %v210_v7 = vld [vmem:[%s716_s1] sm:$0x3]  ;;  %vm222_vm1 = vcmask 31744  }
  0x22   : > { %215 = vperm.xlu0 %450, %v212_v2   ;;  %s386_s29 = sshll.u32 %s555_s15, 2  ;;  %s206_s6 = scalar_lea.vmem [#allocation5], %s376_s18 }
  0x23   : > { %s279_s5 = scalar_lea.hbm %s718_s3, %s386_s29  ;;  %s281_s7 = sshll.u32 %s206_s6, 4  ;;  %s282_s7 = int_to_ptr.vmem [resolvable:$true] %s281_s7 }
  0x24   : > { %s283_s8 = sshll.u32 %s279_s5, 4  ;;  %s266_s15 = scalar_lea.sflag [#allocation4], %s660_s11  ;;  %s284_s8 = int_to_ptr.hbm [resolvable:$true] %s283_s8 }
  0x25   : > { %s495_s9 = sshra.s32 %s284_s8, 4  ;;  %s501_s21 = scalar_lea.hbm %s718_s3, 8  ;;  %s496_s9 = int_to_ptr.hbm [resolvable:$true] %s495_s9 }
  0x26   : > { %s497_s10 = scalar_lea.hbm %s496_s9, 4  ;;  %p502_p7 = scmp.lt.s32.totalorder %s496_s9, %s718_s3 }
  0x27   : > { %p498_p4 = scmp.ne.s32.totalorder %s496_s9, %s497_s10  ;;  %p503_p8 = scmp.lt.s32.totalorder %s501_s21, %s497_s10 }
  0x28   : > { %v220_v3 = vld.sshfl [vmem:[#allocation1] sm:$0xff pattern:$0x73625140]  ;;  %v221_v4 = vld.sshfl [vmem:[#allocation1 + $0x8] sm:$0xff pattern:$0x73625140] }
  0x29   : > { %v227_v5 = vsel %vm226_vm0, %v220_v3, 0  ;;  %v229_v6 = vsel %vm226_vm0, %v221_v4, 0  ;;  %p499_p5 = pnand %p498_p4, %p637_p9  ;;  %p504_p10 = por %p503_p8, %p502_p7 }
  0x2a   : > { %238 = vmatpush.bf16.msra.mxu0 %v227_v5  ;;  %251 = vmatpush.bf16.msra.mxu1 %v229_v6 }
  0x2b   : > { %p500_p6 = pneg %p499_p5 }
  0x2d   : > { %378 = vmatmul.msk.bf16.vlgmr.msra.gmra.mxu0 %vm222_vm1, %v210_v7  ;;  %379 = vmatmul.msk.bf16.vlgmr.msra.gmra.mxu1 %vm222_vm1, %v210_v7  ;;  %p505_p13 = pnand %p504_p10, %p500_p6 }
  0x94   : > { %v216_v8 = vpop.permute.xlu0 %215 }
  0xaa   : > { %v240_v9 = vpop.f32.mrf.mxu0  ;;  %v253_v10 = vpop.f32.mrf.mxu1 }
  0xab   : > { %v241_v11 = vadd.f32 %v240_v9, %v216_v8  ;;  %v254_v12 = vadd.f32 %v253_v10, %v216_v8 }
  0xad   : > { %v257_v13 = vpack.c.bf16 %v254_v12, %v241_v11 }
  0xaf   : > { %v259_v14 = vrot.slane %v257_v13, 2 }
  0xb1   : > { %v262_v15 = vsel %vm226_vm0, %v257_v13, %v259_v14 }
  0xb2   : > { %v242_v16 = vpop.f32.mrf.mxu0  ;;  %v255_v17 = vpop.f32.mrf.mxu1  ;;  %264 = vst [vmem:[%s206_s6] sm:$0xf] %v262_v15 }
  0xb3   : > { %508 = shalt.err (!%p505_p13)
}
  0xb4   : > { %389 = dma.vmem_to_hbm [thread:$0]  (%p637_p9), %s282_s7, 64, %s284_s8, %s266_s15  }
  0xb5 PF: > { %s295_s11 = sand.u32 1, %s543_s12   ;;  %p396_p0 = pnand %p371_p12, %p644_p11 }
  0xb6   : > { %s296_s24 = scalar_lea.sflag [#allocation4], %s295_s11 }
  0xb7   : > { %p397_p1 = pneg %p396_p0 }
  0xb9   : > { %538 = dma.done.wait (%p397_p1), %s296_s24, 64  }
  0xba   : > { %540 = vsyncadd (%p397_p1), %s296_s24, 4294967232  ;;  %s19_s17 = sadd.s32 1, %s563_s17   ;;  %s723_s12 = smov %s547_s13 }
  0xbb   : > { %p16_p2 = scmp.ge.s32.totalorder %s19_s17, 4   ;;  %s724_s13 = smov %s551_s14 }
  0xbc   : > { %s725_s14 = smov %s642_s26  ;;  %s726_s15 = smov %s559_s16 }
  0xbd   : > { %s727_s16 = smov %s729_s20  ;;  %18 = sbr.rel (!%p16_p2) target bundleno = 6 (0x6), region = 77 }
  0xc2   :  { %302 = vsyncpa [#allocation3], 1 }
  0xc3   :  { %304 = vsyncpa [#allocation3 + $0x1], 1 }
  0xc4   :  { %305 = vsyncpa [#allocation4], 1 }
  0xc5   :  { %307 = vsyncpa [#allocation4 + $0x1], 1 }

</bundles_post_ra>
